<compile_context>
chip_gen: v7x
topology: tpu7x:2x2x1
jax: 0.10.0
libtpu: 0.0.40
codegen_flags: <defaults>
</compile_context>

<pallas_src>
import math

import jax
import jax.numpy as jnp
from jax.experimental import pallas as pl
from jax.experimental.pallas import tpu as pltpu


_BLOCK_KEYS = ("ln_q_g", "ln_q_b", "ln_kv_g", "ln_kv_b",
               "wq", "bq", "wk", "bk", "wv", "bv", "wo", "bo",
               "ln_ff_g", "ln_ff_b", "wff1", "bff1", "wff2", "bff2")


# ----------------------------- in-kernel building blocks ------------------------------

def _layer_norm(x, g, b, eps=1e-5):
    mu = jnp.mean(x, axis=-1, keepdims=True)
    var = jnp.mean((x - mu) ** 2, axis=-1, keepdims=True)
    return (x - mu) * jax.lax.rsqrt(var + eps) * g + b


def _attention_block(p, q_in, kv_in, mask_bias, heads):
    """Pre-norm MHA + GELU-MLP block on one sample, traced inside a Pallas kernel.

    q_in: (Lq, D), kv_in: (Lk, D), mask_bias: (1, Lk) additive key-padding bias (-1e9 on pads).
    `p` is a dict of VMEM weight refs.
    """
    Lq, D = q_in.shape
    dh = D // heads
    scale = 1.0 / math.sqrt(dh)

    qn = _layer_norm(q_in, p["ln_q_g"][...], p["ln_q_b"][...])
    kn = _layer_norm(kv_in, p["ln_kv_g"][...], p["ln_kv_b"][...])
    q = jnp.dot(qn, p["wq"][...], preferred_element_type=jnp.float32) + p["bq"][...]
    k = jnp.dot(kn, p["wk"][...], preferred_element_type=jnp.float32) + p["bk"][...]
    v = jnp.dot(kn, p["wv"][...], preferred_element_type=jnp.float32) + p["bv"][...]

    # MHA fused with the output projection: accumulate per-head (P_h V_h) @ Wo[rows_h]
    # directly into a full-width (Lq, D) accumulator — no lane-dim concatenate.
    wo = p["wo"][...]
    acc = jnp.zeros((Lq, D), jnp.float32)
    for h in range(heads):
        sl = slice(h * dh, (h + 1) * dh)
        s = jax.lax.dot_general(q[:, sl], k[:, sl], (((1,), (1,)), ((), ())),
                                preferred_element_type=jnp.float32) * scale
        s = s + mask_bias                                  # key padding mask
        s = s - jnp.max(s, axis=-1, keepdims=True)
        e = jnp.exp(s)
        pr = e / jnp.sum(e, axis=-1, keepdims=True)
        o_h = jnp.dot(pr, v[:, sl], preferred_element_type=jnp.float32)
        acc = acc + jnp.dot(o_h, wo[sl, :], preferred_element_type=jnp.float32)

    x = q_in + acc + p["bo"][...]

    xn = _layer_norm(x, p["ln_ff_g"][...], p["ln_ff_b"][...])
    hdn = jax.nn.gelu(jnp.dot(xn, p["wff1"][...], preferred_element_type=jnp.float32)
                      + p["bff1"][...], approximate=True)
    ff = jnp.dot(hdn, p["wff2"][...], preferred_element_type=jnp.float32) + p["bff2"][...]
    return x + ff


# ----------------------------- kernel 1: fused token embedding ------------------------------

def _embed_kernel(x_ref, pos_ref, pw_ref, pb_ref, aw_ref, cw_ref, ab_ref, o_ref):
    # gelu( (x @ Wproj + bproj) @ Wpre[:D] + pos @ Wpre[D:] + bpre )  — the concat of the
    # projected tokens with the pos-encoding is folded into the split matmul.
    t1 = jnp.dot(x_ref[...], pw_ref[...], preferred_element_type=jnp.float32) + pb_ref[...]
    h = (jnp.dot(t1, aw_ref[...], preferred_element_type=jnp.float32)
         + jnp.dot(pos_ref[...], cw_ref[...], preferred_element_type=jnp.float32)
         + ab_ref[...])
    o_ref[...] = jax.nn.gelu(h, approximate=True).astype(o_ref.dtype)


def token_embed(tokens2d, pos2d, proj_w, proj_b, pre_w, pre_b):
    M, E = tokens2d.shape
    P = pos2d.shape[1]
    D = proj_w.shape[1]
    pre_w_tok = pre_w[:D]      # (D, D)
    pre_w_pos = pre_w[D:]      # (P, D)
    # NOTE: at production shapes this should be tiled over M (e.g. 512-row blocks, axis
    # marked "parallel"); at the test size one full-array block is optimal.
    return pl.pallas_call(
        _embed_kernel,
        out_shape=jax.ShapeDtypeStruct((M, D), jnp.float32),
        grid=(1,),
        in_specs=[pl.BlockSpec((M, E), lambda i: (0, 0)),
                  pl.BlockSpec((M, P), lambda i: (0, 0)),
                  pl.BlockSpec((E, D), lambda i: (0, 0)),
                  pl.BlockSpec((1, D), lambda i: (0, 0)),
                  pl.BlockSpec((D, D), lambda i: (0, 0)),
                  pl.BlockSpec((P, D), lambda i: (0, 0)),
                  pl.BlockSpec((1, D), lambda i: (0, 0))],
        out_specs=pl.BlockSpec((M, D), lambda i: (0, 0)),
    )(tokens2d, pos2d, proj_w, proj_b, pre_w_tok, pre_w_pos, pre_b)


# ----------------------------- kernel 2: fused time loop ------------------------------

def _const_spec(a):
    zeros = (0,) * a.ndim
    return pl.BlockSpec(a.shape, lambda b, t, _z=zeros: _z)


def evt_time_loop(tok, mask_bias, mask_time, bb, cr, an_g, an_b, latents, *,
                  heads, skip_conn):
    """Runs the whole T-step recurrence for all B samples in one pallas_call.

    tok:       (T, B, N, D) preprocessed tokens
    mask_bias: (T, B, 1, N) additive key-padding bias (-1e9 on padded tokens)
    mask_time: (T, B, 1, 1) float, 1.0 where the whole frame is empty
    latents:   (L, D) raw latent vectors
    Returns (B, L, D) final latent memory.
    """
    T, B, N, D = tok.shape
    L = latents.shape[0]

    weight_list = ([bb[k] for k in _BLOCK_KEYS] + [cr[k] for k in _BLOCK_KEYS]
                   + [an_g, an_b, latents])
    n_w = len(weight_list)
    n_blk = len(_BLOCK_KEYS)

    def kernel(tok_ref, mb_ref, mt_ref, *rest):
        wrefs = rest[:n_w]
        out_ref = rest[n_w]
        lat_sc = rest[n_w + 1]
        bbp = dict(zip(_BLOCK_KEYS, wrefs[:n_blk]))
        crp = dict(zip(_BLOCK_KEYS, wrefs[n_blk:2 * n_blk]))
        an_g_ref, an_b_ref, raw_ref = wrefs[2 * n_blk:]

        t = pl.program_id(1)
        raw = raw_ref[...]                                  # (L, D)

        @pl.when(t == 0)
        def _init():                                        # reset latent memory per sample
            lat_sc[...] = raw

        shortcut = tok_ref[0, 0]                            # (N, D)
        mbias = mb_ref[0, 0]                                # (1, N)
        mt = mt_ref[0, 0]                                   # (1, 1), 1.0 == empty frame

        # backbone self-attention block (+ optional skip connection)
        x = _attention_block(bbp, shortcut, shortcut, mbias, heads)
        if skip_conn:
            x = x + shortcut

        # cross-attention: latents attend to processed tokens
        prev = lat_sc[...]                                  # (L, D)
        new_lat = _attention_block(crp, prev, x, mbias, heads)

        # latent memory update: LayerNorm(prev + new); empty frames reset to raw latents
        z = prev + new_lat
        mu = jnp.mean(z, axis=-1, keepdims=True)
        var = jnp.mean((z - mu) ** 2, axis=-1, keepdims=True)
        updated = (z - mu) * jax.lax.rsqrt(var + 1e-5) * an_g_ref[...] + an_b_ref[...]
        lat_sc[...] = jnp.where(mt > 0.5, raw, updated)

        @pl.when(t == pl.num_programs(1) - 1)
        def _fin():
            out_ref[0] = lat_sc[...]

    in_specs = ([pl.BlockSpec((1, 1, N, D), lambda b, t: (t, b, 0, 0)),
                 pl.BlockSpec((1, 1, 1, N), lambda b, t: (t, b, 0, 0)),
                 pl.BlockSpec((1, 1, 1, 1), lambda b, t: (t, b, 0, 0))]
                + [_const_spec(w) for w in weight_list])

    return pl.pallas_call(
        kernel,
        out_shape=jax.ShapeDtypeStruct((B, L, D), jnp.float32),
        grid_spec=pltpu.PrefetchScalarGridSpec(
            num_scalar_prefetch=0,
            grid=(B, T),
            in_specs=in_specs,
            out_specs=pl.BlockSpec((1, L, D), lambda b, t: (b, 0, 0)),
            scratch_shapes=[pltpu.VMEM((L, D), jnp.float32)]),
        compiler_params=pltpu.CompilerParams(
            dimension_semantics=("parallel", "arbitrary")),
    )(tok, mask_bias, mask_time, *weight_list)


# ----------------------------- kernel 3: decoder ------------------------------

def clf_decoder(z3, w1, b1, w2, b2, w3, b3):
    B, L, D = z3.shape
    C = w3.shape[1]

    def kernel(z_ref, w1_ref, b1_ref, w2_ref, b2_ref, w3_ref, b3_ref, o_ref):
        w1v = w1_ref[...]
        b1v = b1_ref[...]
        means = []
        for b in range(B):
            h = jnp.maximum(
                jnp.dot(z_ref[b], w1v, preferred_element_type=jnp.float32) + b1v, 0.0)
            means.append(jnp.mean(h, axis=0, keepdims=True))    # mean over L latents
        m = jnp.concatenate(means, axis=0)                      # (B, D)
        h2 = jnp.maximum(
            jnp.dot(m, w2_ref[...], preferred_element_type=jnp.float32) + b2_ref[...], 0.0)
        logits = jnp.dot(h2, w3_ref[...], preferred_element_type=jnp.float32) + b3_ref[...]
        s = logits - jnp.max(logits, axis=-1, keepdims=True)
        lse = jnp.log(jnp.sum(jnp.exp(s), axis=-1, keepdims=True))
        o_ref[...] = (s - lse).astype(o_ref.dtype)              # log_softmax

    return pl.pallas_call(
        kernel,
        out_shape=jax.ShapeDtypeStruct((B, C), jnp.float32),
        grid=(1,),
        in_specs=[pl.BlockSpec((B, L, D), lambda i: (0, 0, 0)),
                  pl.BlockSpec((D, D), lambda i: (0, 0)),
                  pl.BlockSpec((1, D), lambda i: (0, 0)),
                  pl.BlockSpec((D, D), lambda i: (0, 0)),
                  pl.BlockSpec((1, D), lambda i: (0, 0)),
                  pl.BlockSpec((D, C), lambda i: (0, 0)),
                  pl.BlockSpec((1, C), lambda i: (0, 0))],
        out_specs=pl.BlockSpec((B, C), lambda i: (0, 0)),
    )(z3, w1, b1, w2, b2, w3, b3)


# ----------------------------- parameters ------------------------------

def fourier_features(shape, bands):
    H, W = shape
    ys = jnp.linspace(-1.0, 1.0, H)
    xs = jnp.linspace(-1.0, 1.0, W)
    pos = jnp.stack(jnp.meshgrid(ys, xs, indexing="ij"), axis=-1)        # (H, W, 2)
    freqs = jnp.linspace(1.0, max(H, W) / 2.0, bands)
    ang = pos[..., None] * freqs * jnp.pi                                # (H, W, 2, bands)
    feats = jnp.concatenate([jnp.sin(ang), jnp.cos(ang)], axis=-1)       # (H, W, 2, 2*bands)
    feats = feats.reshape(H, W, 4 * bands)
    return jnp.concatenate([pos, feats], axis=-1).astype(jnp.float32)    # (H, W, 2 + 4*bands)


def _dense(key, fan_in, fan_out):
    k1, k2 = jax.random.split(key)
    lim = 1.0 / math.sqrt(fan_in)
    w = jax.random.uniform(k1, (fan_in, fan_out), jnp.float32, -lim, lim)
    b = jax.random.uniform(k2, (1, fan_out), jnp.float32, -lim, lim)
    return w, b


def init_attention_block(key, dim, heads, ff_mult=2):
    keys = jax.random.split(key, 6)
    p = {"heads": heads}
    p["ln_q_g"] = jnp.ones((1, dim), jnp.float32)
    p["ln_q_b"] = jnp.zeros((1, dim), jnp.float32)
    p["ln_kv_g"] = jnp.ones((1, dim), jnp.float32)
    p["ln_kv_b"] = jnp.zeros((1, dim), jnp.float32)
    p["wq"], p["bq"] = _dense(keys[0], dim, dim)
    p["wk"], p["bk"] = _dense(keys[1], dim, dim)
    p["wv"], p["bv"] = _dense(keys[2], dim, dim)
    p["wo"], p["bo"] = _dense(keys[3], dim, dim)
    p["ln_ff_g"] = jnp.ones((1, dim), jnp.float32)
    p["ln_ff_b"] = jnp.zeros((1, dim), jnp.float32)
    p["wff1"], p["bff1"] = _dense(keys[4], dim, ff_mult * dim)
    p["wff2"], p["bff2"] = _dense(keys[5], ff_mult * dim, dim)
    return p


def init_evt_clf(key, *, embed_dim, events_dim, heads, sensor_shape, downsample_pos_enc,
                 fourier_bands, num_latent_vectors, num_classes, skip_conn_backbone=True):
    keys = jax.random.split(key, 8)
    H = math.ceil(sensor_shape[0] / downsample_pos_enc)
    W = math.ceil(sensor_shape[1] / downsample_pos_enc)
    pos_encoding = fourier_features((H, W), fourier_bands)
    P = pos_encoding.shape[-1]

    params = {
        "downsample": downsample_pos_enc,
        "embed_dim": embed_dim,
        "skip_conn_backbone": skip_conn_backbone,
        "pos_encoding": pos_encoding,
    }
    params["proj_w"], params["proj_b"] = _dense(keys[0], events_dim, embed_dim)
    params["pre_w"], params["pre_b"] = _dense(keys[1], embed_dim + P, embed_dim)
    params["backbone"] = init_attention_block(keys[2], embed_dim, heads)
    params["cross"] = init_attention_block(keys[3], embed_dim, heads)
    params["an_g"] = jnp.ones((1, embed_dim), jnp.float32)
    params["an_b"] = jnp.zeros((1, embed_dim), jnp.float32)
    lat = jax.random.normal(keys[4], (num_latent_vectors, embed_dim), jnp.float32) * 0.2
    params["latent_vectors"] = jnp.clip(lat, -2.0, 2.0)
    params["dec_w1"], params["dec_b1"] = _dense(keys[5], embed_dim, embed_dim)
    params["dec_w2"], params["dec_b2"] = _dense(keys[6], embed_dim, embed_dim)
    params["dec_w3"], params["dec_b3"] = _dense(keys[7], embed_dim, num_classes)
    return params


# ----------------------------- forward ------------------------------

def evt_clf_forward(params, tokens_events, pixels_events):
    ds = params["downsample"]
    D = params["embed_dim"]

    pixels = pixels_events // ds                                   # trunc-div of non-negative ints
    tokens = jnp.transpose(tokens_events, (1, 0, 2, 3))            # (T, B, N, E)
    pixels = jnp.transpose(pixels, (1, 0, 2, 3))                   # (T, B, N, 2)
    T, B, N, E = tokens.shape

    tok_sum = tokens.sum(-1)
    samples_mask = tok_sum == 0                                    # (T, B, N) True == padded token
    samples_mask_time = tok_sum.sum(-1) == 0                       # (T, B)    True == empty frame

    # position-encoding gather (data-dependent advanced indexing — JAX glue, see TODO)
    pos = params["pos_encoding"][pixels[..., 1], pixels[..., 0], :]    # (T, B, N, P)
    P = pos.shape[-1]

    # kernel 1: fused projection + pos mix + preproc
    tok = token_embed(tokens.reshape(-1, E), pos.reshape(-1, P),
                      params["proj_w"], params["proj_b"],
                      params["pre_w"], params["pre_b"]).reshape(T, B, N, D)

    mask_bias = samples_mask.astype(jnp.float32).reshape(T, B, 1, N) * (-1e9)
    mask_time = samples_mask_time.astype(jnp.float32).reshape(T, B, 1, 1)

    # kernel 2: fused backbone + cross-attention + latent-memory recurrence over (B, T)
    latents = evt_time_loop(tok, mask_bias, mask_time,
                            params["backbone"], params["cross"],
                            params["an_g"], params["an_b"], params["latent_vectors"],
                            heads=params["backbone"]["heads"],
                            skip_conn=params["skip_conn_backbone"])   # (B, L, D)

    # kernel 3: decoder (num_attention_blocks = 0, softmax=True -> log_softmax)
    return clf_decoder(latents,
                       params["dec_w1"], params["dec_b1"],
                       params["dec_w2"], params["dec_b2"],
                       params["dec_w3"], params["dec_b3"])


# ----------------------------- main ------------------------------

if __name__ == "__main__":
    key = jax.random.PRNGKey(0)
    k_params, k_tok, k_pix = jax.random.split(key, 3)

    B, T, N, E = 2, 3, 8, 4
    NUM_CLASSES = 10
    params = init_evt_clf(k_params, embed_dim=32, events_dim=E, heads=4,
                          sensor_shape=(16, 16), downsample_pos_enc=2, fourier_bands=4,
                          num_latent_vectors=8, num_classes=NUM_CLASSES,
                          skip_conn_backbone=True)

    tokens_events = jax.random.uniform(k_tok, (B, T, N, E), jnp.float32, 0.1, 1.0)
    # exercise the padding masks: one padded token and one completely empty frame
    tokens_events = tokens_events.at[0, 1, 3, :].set(0.0)
    tokens_events = tokens_events.at[1, 2, :, :].set(0.0)
    pixels_events = jax.random.randint(k_pix, (B, T, N, 2), 0, 16, dtype=jnp.int32)

    out = evt_clf_forward(params, tokens_events, pixels_events)
    out = jax.block_until_ready(out)
    assert out.shape == (B, NUM_CLASSES)
    assert bool(jnp.all(jnp.isfinite(out)))
    print("KERNEL_OK")
</pallas_src>

<mosaic_0001>
module attributes {stable_mosaic.version = 11 : i64} {
  func.func @_embed_kernel(%arg0: i32, %arg1: memref<48x4xf32, #tpu.memory_space<vmem>>, %arg2: memref<48x18xf32, #tpu.memory_space<vmem>>, %arg3: memref<4x32xf32, #tpu.memory_space<vmem>>, %arg4: memref<1x32xf32, #tpu.memory_space<vmem>>, %arg5: memref<32x32xf32, #tpu.memory_space<vmem>>, %arg6: memref<18x32xf32, #tpu.memory_space<vmem>>, %arg7: memref<1x32xf32, #tpu.memory_space<vmem>>, %arg8: memref<48x32xf32, #tpu.memory_space<vmem>>) attributes {dimension_semantics = [#tpu.dimension_semantics<arbitrary>], iteration_bounds = array<i64: 1>, scalar_prefetch = 0 : i64, scratch_operands = 0 : i64, tpu.core_type = #tpu.core_type<tc>, window_params = [{pipeline_mode = #tpu.pipeline_mode<synchronous>, transform_indices = @transform_0, window_bounds = array<i64: 48, 4>}, {pipeline_mode = #tpu.pipeline_mode<synchronous>, transform_indices = @transform_1, window_bounds = array<i64: 48, 18>}, {pipeline_mode = #tpu.pipeline_mode<synchronous>, transform_indices = @transform_2, window_bounds = array<i64: 4, 32>}, {pipeline_mode = #tpu.pipeline_mode<synchronous>, transform_indices = @transform_3, window_bounds = array<i64: 1, 32>}, {pipeline_mode = #tpu.pipeline_mode<synchronous>, transform_indices = @transform_4, window_bounds = array<i64: 32, 32>}, {pipeline_mode = #tpu.pipeline_mode<synchronous>, transform_indices = @transform_5, window_bounds = array<i64: 18, 32>}, {pipeline_mode = #tpu.pipeline_mode<synchronous>, transform_indices = @transform_6, window_bounds = array<i64: 1, 32>}, {pipeline_mode = #tpu.pipeline_mode<synchronous>, transform_indices = @transform_7, window_bounds = array<i64: 48, 32>}]} {
    %c0 = arith.constant 0 : index
    %c0_0 = arith.constant 0 : index
    %0 = vector.load %arg1[%c0, %c0_0] : memref<48x4xf32, #tpu.memory_space<vmem>>, vector<48x4xf32>
    %c0_1 = arith.constant 0 : index
    %c0_2 = arith.constant 0 : index
    %1 = vector.load %arg3[%c0_1, %c0_2] : memref<4x32xf32, #tpu.memory_space<vmem>>, vector<4x32xf32>
    %cst = arith.constant dense<0.000000e+00> : vector<48x32xf32>
    %2 = tpu.matmul %0, %1, %cst {dimension_numbers = #tpu.dot_dimension_numbers<[1], [0], [0], [1], [0, 0, 1, 1], [], []>} : vector<48x4xf32>, vector<4x32xf32>, vector<48x32xf32> -> vector<48x32xf32>
    %c0_3 = arith.constant 0 : index
    %c0_4 = arith.constant 0 : index
    %3 = vector.load %arg4[%c0_3, %c0_4] : memref<1x32xf32, #tpu.memory_space<vmem>>, vector<1x32xf32>
    %4 = vector.broadcast %3 : vector<1x32xf32> to vector<48x32xf32>
    %5 = arith.addf %2, %4 : vector<48x32xf32>
    %c0_5 = arith.constant 0 : index
    %c0_6 = arith.constant 0 : index
    %6 = vector.load %arg5[%c0_5, %c0_6] : memref<32x32xf32, #tpu.memory_space<vmem>>, vector<32x32xf32>
    %cst_7 = arith.constant dense<0.000000e+00> : vector<48x32xf32>
    %7 = tpu.matmul %5, %6, %cst_7 {dimension_numbers = #tpu.dot_dimension_numbers<[1], [0], [0], [1], [0, 0, 1, 1], [], []>} : vector<48x32xf32>, vector<32x32xf32>, vector<48x32xf32> -> vector<48x32xf32>
    %c0_8 = arith.constant 0 : index
    %c0_9 = arith.constant 0 : index
    %8 = vector.load %arg2[%c0_8, %c0_9] : memref<48x18xf32, #tpu.memory_space<vmem>>, vector<48x18xf32>
    %c0_10 = arith.constant 0 : index
    %c0_11 = arith.constant 0 : index
    %9 = vector.load %arg6[%c0_10, %c0_11] : memref<18x32xf32, #tpu.memory_space<vmem>>, vector<18x32xf32>
    %cst_12 = arith.constant dense<0.000000e+00> : vector<48x32xf32>
    %10 = tpu.matmul %8, %9, %cst_12 {dimension_numbers = #tpu.dot_dimension_numbers<[1], [0], [0], [1], [0, 0, 1, 1], [], []>} : vector<48x18xf32>, vector<18x32xf32>, vector<48x32xf32> -> vector<48x32xf32>
    %11 = arith.addf %7, %10 : vector<48x32xf32>
    %c0_13 = arith.constant 0 : index
    %c0_14 = arith.constant 0 : index
    %12 = vector.load %arg7[%c0_13, %c0_14] : memref<1x32xf32, #tpu.memory_space<vmem>>, vector<1x32xf32>
    %13 = vector.broadcast %12 : vector<1x32xf32> to vector<48x32xf32>
    %14 = arith.addf %11, %13 : vector<48x32xf32>
    %15 = arith.mulf %14, %14 : vector<48x32xf32>
    %16 = arith.mulf %14, %15 : vector<48x32xf32>
    %cst_15 = arith.constant 4.471500e-02 : f32
    %17 = vector.broadcast %cst_15 : f32 to vector<48x32xf32>
    %18 = arith.mulf %17, %16 : vector<48x32xf32>
    %19 = arith.addf %14, %18 : vector<48x32xf32>
    %cst_16 = arith.constant 0.797884583 : f32
    %20 = vector.broadcast %cst_16 : f32 to vector<48x32xf32>
    %21 = arith.mulf %20, %19 : vector<48x32xf32>
    %22 = math.tanh %21 : vector<48x32xf32>
    %cst_17 = arith.constant 1.000000e+00 : f32
    %23 = vector.broadcast %cst_17 : f32 to vector<48x32xf32>
    %24 = arith.addf %23, %22 : vector<48x32xf32>
    %cst_18 = arith.constant 5.000000e-01 : f32
    %25 = vector.broadcast %cst_18 : f32 to vector<48x32xf32>
    %26 = arith.mulf %25, %24 : vector<48x32xf32>
    %27 = arith.mulf %14, %26 : vector<48x32xf32>
    %c0_19 = arith.constant 0 : index
    %c0_20 = arith.constant 0 : index
    %28 = vector.load %arg8[%c0_19, %c0_20] : memref<48x32xf32, #tpu.memory_space<vmem>>, vector<48x32xf32>
    tpu.vector_store %arg8[%c0_19, %c0_20], %27 {strides = array<i32>} : memref<48x32xf32, #tpu.memory_space<vmem>>, vector<48x32xf32>,
    return
  }
  func.func @transform_0(%arg0: i32) -> (i32, i32) {
    %c0_i32 = arith.constant 0 : i32
    %c0_i32_0 = arith.constant 0 : i32
    %c0_i32_1 = arith.constant 0 : i32
    return %c0_i32, %c0_i32_0 : i32, i32
  }
  func.func @transform_1(%arg0: i32) -> (i32, i32) {
    %c0_i32 = arith.constant 0 : i32
    %c0_i32_0 = arith.constant 0 : i32
    %c0_i32_1 = arith.constant 0 : i32
    return %c0_i32, %c0_i32_0 : i32, i32
  }
  func.func @transform_2(%arg0: i32) -> (i32, i32) {
    %c0_i32 = arith.constant 0 : i32
    %c0_i32_0 = arith.constant 0 : i32
    %c0_i32_1 = arith.constant 0 : i32
    return %c0_i32, %c0_i32_0 : i32, i32
  }
  func.func @transform_3(%arg0: i32) -> (i32, i32) {
    %c0_i32 = arith.constant 0 : i32
    %c0_i32_0 = arith.constant 0 : i32
    %c0_i32_1 = arith.constant 0 : i32
    return %c0_i32, %c0_i32_0 : i32, i32
  }
  func.func @transform_4(%arg0: i32) -> (i32, i32) {
    %c0_i32 = arith.constant 0 : i32
    %c0_i32_0 = arith.constant 0 : i32
    %c0_i32_1 = arith.constant 0 : i32
    return %c0_i32, %c0_i32_0 : i32, i32
  }
  func.func @transform_5(%arg0: i32) -> (i32, i32) {
    %c0_i32 = arith.constant 0 : i32
    %c0_i32_0 = arith.constant 0 : i32
    %c0_i32_1 = arith.constant 0 : i32
    return %c0_i32, %c0_i32_0 : i32, i32
  }
  func.func @transform_6(%arg0: i32) -> (i32, i32) {
    %c0_i32 = arith.constant 0 : i32
    %c0_i32_0 = arith.constant 0 : i32
    %c0_i32_1 = arith.constant 0 : i32
    return %c0_i32, %c0_i32_0 : i32, i32
  }
  func.func @transform_7(%arg0: i32) -> (i32, i32) {
    %c0_i32 = arith.constant 0 : i32
    %c0_i32_0 = arith.constant 0 : i32
    %c0_i32_1 = arith.constant 0 : i32
    return %c0_i32, %c0_i32_0 : i32, i32
  }
}

</mosaic_0001>

<bundles_post_ra>
// kernel: tpu_custom_call.1
= control target key start
LH: loop header
LB: loop body
LE: loop exit
PB: predicated region body
PF: predicated region fallthrough
CT: control target
= control target key end

     0   :  { %vm59_vm0 = vcmask 1043456   ;;  %vm40_vm1 = vcmask 31744   ;;  %vm171_vm2 = vcmask 146432   ;;  %vm190_vm3 = vcmask 1041408   ;;  %s753_s2 = inlined_call_operand.vmem [shape: f32[4,32], index: 2, kind: input, shape index: {}]   ;;  %s754_s0 = inlined_call_operand.vmem [shape: f32[48,4], index: 0, kind: input, shape index: {}]   ;;  %s755_s5 = inlined_call_operand.vmem [shape: f32[18,32], index: 5, kind: input, shape index: {}]   ;;  %s756_s4 = inlined_call_operand.vmem [shape: f32[32,32], index: 4, kind: input, shape index: {}]   ;;  %s757_s1 = inlined_call_operand.vmem [shape: f32[48,18], index: 1, kind: input, shape index: {}]   ;;  %s758_s3 = inlined_call_operand.vmem [shape: f32[1,32], index: 3, kind: input, shape index: {}]   ;;  %s759_s6 = inlined_call_operand.vmem [shape: f32[1,32], index: 6, kind: input, shape index: {}]   ;;  %s760_s7 = inlined_call_operand.vmem [shape: f32[48,32], index: 7, kind: output, shape index: {}]  }
   0x1   :  { %v32_v0 = vld [vmem:[%s753_s2] sm:$0xf]  ;;  %v27_v2 = vld [vmem:[%s754_s0 + $0x8] sm:$0xff]  ;;  %v28_v3 = vld [vmem:[%s754_s0 + $0x10] sm:$0xff]  ;;  %vm289_vm4 = vcmask 261120  }
   0x2   :  { %v26_v1 = vld [vmem:[%s754_s0] sm:$0xff]  ;;  %528 = vmatprep.subr.msk.mxu0 %vm59_vm0, %v32_v0  ;;  %v169_v5 = vld [vmem:[%s755_s5 + $0x8] sm:$0xff]  ;;  %v29_v9 = vld [vmem:[%s754_s0 + $0x18] sm:$0xff] }
   0x3   :  { %530 = vmatprep.mubr.msk.f32.mxu0 %vm40_vm1, %v26_v1  ;;  %529 = vmatpush3.msk.msra.mxu0 %vm59_vm0, %v32_v0  ;;  %v168_v4 = vld [vmem:[%s755_s5] sm:$0xff]  ;;  %v159_v8 = vld [vmem:[%s756_s4 + $0x8] sm:$0xff]  ;;  %v170_v10 = vld [vmem:[%s755_s5 + $0x10] sm:$0x3] }
   0x4   :  { %531 = vmatmul.mubr.msk.f32.vlgmr.msra.gmra.mrb[0].mxu0 %vm40_vm1, %v27_v2  ;;  %v571_v6 = vpack.c.bf16 %v169_v5, %v168_v4  ;;  %v158_v7 = vld [vmem:[%s756_s4] sm:$0xff]  ;;  %v31_v14 = vld [vmem:[%s754_s0 + $0x28] sm:$0xff]  ;;  %v164_v16 = vld [vmem:[%s757_s1 + $0x10] sm:$0xff] }
   0x5   :  { %533 = vmatprep.mubr.msk.f32.mxu0 %vm40_vm1, %v28_v3  ;;  %v575_v11 = vpack.c.bf16 %v159_v8, %v158_v7  ;;  %v162_v12 = vld [vmem:[%s757_s1] sm:$0xff]  ;;  %v163_v15 = vld [vmem:[%s757_s1 + $0x8] sm:$0xff]  ;;  %v160_v17 = vld [vmem:[%s756_s4 + $0x10] sm:$0xff] }
   0x6   :  { %v30_v13 = vld [vmem:[%s754_s0 + $0x20] sm:$0xff]  ;;  %572 = vmatprep.subr.bf16.mxu1 %v571_v6  ;;  %545 = vmatprep.mubr.msk.f32.mxu1 %vm171_vm2, %v162_v12  ;;  %v161_v18 = vld [vmem:[%s756_s4 + $0x18] sm:$0xff]  ;;  %v167_v22 = vld [vmem:[%s757_s1 + $0x28] sm:$0xff] }
   0x7   :  { %574 = vmatpush3.bf16.msra.mxu1 %v571_v6  ;;  %576 = vmatprep.subr.bf16.mxu0 %v575_v11  ;;  %v165_v19 = vld [vmem:[%s757_s1 + $0x18] sm:$0xff]  ;;  %v579_v20 = vpack.c.bf16 %v161_v18, %v160_v17  ;;  %v166_v21 = vld [vmem:[%s757_s1 + $0x20] sm:$0xff] }
   0x8   :  { %534 = vmatmul.mubr.msk.f32.gmra.mrb[2].mxu0 %vm40_vm1, %v29_v9  ;;  %543 = vmatprep.subr.msk.mxu1 %vm190_vm3, %v170_v10  ;;  %v480_v23 = vld [vmem:[%s758_s3] ss:$0 sm:$0xff] }
   0x9   :  { %536 = vmatprep.mubr.msk.f32.mxu0 %vm40_vm1, %v30_v13  ;;  %578 = vmatpush3.bf16.msra.mxu0 %v575_v11  ;;  %v501_v41 = vld [vmem:[%s759_s6] ss:$0 sm:$0xff] }
   0xa   :  { %580 = vmatprep.subr.bf16.mxu0 %v579_v20 }
   0xb   :  { %544 = vmatpush3.msk.msra.mxu1 %vm190_vm3, %v170_v10 }
   0xc   :  { %537 = vmatmul.mubr.msk.f32.gmra.mrb[4].mxu0 %vm40_vm1, %v31_v14  ;;  %546 = vmatmul.mubr.msk.f32.vlgmr.msra.gmra.mrb[0].mxu1 %vm171_vm2, %v163_v15 }
   0xd   :  { %583 = vmatprep.subr.bf16.mxu1 %v575_v11  ;;  %548 = vmatprep.mubr.msk.f32.mxu1 %vm171_vm2, %v164_v16 }
   0xe   :  { %585 = vmatpush3.bf16.msra.mxu1 %v575_v11  ;;  %582 = vmatpush3.bf16.msra.mxu0 %v579_v20 }
   0xf   :  { %584 = vmatprep.subr.bf16.mxu1 %v579_v20 }
  0x10   :  { %549 = vmatmul.mubr.msk.f32.gmra.mrb[2].mxu1 %vm171_vm2, %v165_v19 }
  0x11   :  { %551 = vmatprep.mubr.msk.f32.mxu1 %vm171_vm2, %v166_v21 }
  0x12   :  { %586 = vmatpush3.bf16.msra.mxu1 %v579_v20 }
  0x14   :  { %552 = vmatmul.mubr.msk.f32.gmra.mrb[4].mxu1 %vm171_vm2, %v167_v22 }
  0xd7   :  { %v532_v24 = vpop.f32.mrb[0].mxu0 }
  0xd8   :  { %v129_v25 = vpop.f32.mrb[1].mxu0  ;;  %v135_v27 = vadd.f32 %v532_v24, %v480_v23 }
  0xd9   :  { %v130_v26 = vadd.f32 %v480_v23, %v129_v25 }
  0xdb   :  { %v535_v28 = vpop.f32.mrb[2].mxu0  ;;  %562 = vmatprep.mubr.msk.f32.mxu0 %vm289_vm4, %v130_v26 }
  0xdc   :  { %v139_v29 = vpop.f32.mrb[3].mxu0  ;;  %563 = vmatmul.mubr.msk.f32.vlgmr.msra.gmra.mrb[6].mxu0 %vm289_vm4, %v135_v27  ;;  %v145_v31 = vadd.f32 %v535_v28, %v480_v23 }
  0xdd   :  { %v140_v30 = vadd.f32 %v480_v23, %v139_v29 }
  0xdf   :  { %v538_v32 = vpop.f32.mrb[4].mxu0  ;;  %565 = vmatprep.mubr.msk.f32.mxu0 %vm289_vm4, %v140_v30  ;;  %v547_v33 = vpop.f32.mrb[0].mxu1 }
  0xe0   :  { %v149_v34 = vpop.f32.mrb[5].mxu0  ;;  %566 = vmatmul.mubr.msk.f32.gmra.mrb[8].mxu0 %vm289_vm4, %v145_v31  ;;  %v260_v35 = vpop.f32.mrb[1].mxu1  ;;  %v155_v37 = vadd.f32 %v538_v32, %v480_v23 }
  0xe1   :  { %v150_v36 = vadd.f32 %v480_v23, %v149_v34 }
  0xe3   :  { %568 = vmatprep.mubr.msk.f32.mxu1 %vm289_vm4, %v150_v36  ;;  %v550_v38 = vpop.f32.mrb[2].mxu1 }
  0xe4   :  { %569 = vmatmul.mubr.msk.f32.vlgmr.msra.gmra.mrb[4].mxu1 %vm289_vm4, %v155_v37  ;;  %v270_v39 = vpop.f32.mrb[3].mxu1 }
 0x1af   :  { %v564_v40 = vpop.f32.mrb[6].mxu0 }
 0x1b0   :  { %v380_v42 = vadd.f32 %v564_v40, %v547_v33  ;;  %v374_v43 = vpop.f32.mrb[7].mxu0 }
 0x1b1   :  { %v375_v44 = vadd.f32 %v374_v43, %v260_v35 }
 0x1b2   :  { %v411_v45 = vadd.f32 %v501_v41, %v380_v42 }
 0x1b3   :  { %v410_v46 = vadd.f32 %v501_v41, %v375_v44  ;;  %v567_v47 = vpop.f32.mrb[8].mxu0 }
 0x1b4   :  { %v417_v48 = vmul.f32 %v411_v45, %v411_v45  ;;  %v390_v49 = vadd.f32 %v567_v47, %v550_v38  ;;  %v384_v50 = vpop.f32.mrb[9].mxu0 }
 0x1b5   :  { %v416_v51 = vmul.f32 %v410_v46, %v410_v46  ;;  %v385_v52 = vadd.f32 %v384_v50, %v270_v39 }
 0x1b6   :  { %v423_v53 = vmul.f32 %v417_v48, %v411_v45  ;;  %v413_v54 = vadd.f32 %v501_v41, %v390_v49 }
 0x1b7   :  { %v422_v55 = vmul.f32 %v416_v51, %v410_v46  ;;  %v412_v56 = vadd.f32 %v501_v41, %v385_v52  ;;  %v570_v57 = vpop.f32.mrb[4].mxu1 }
 0x1b8   :  { %v429_v58 = vmul.f32 0.044715, %v423_v53  ;;  %v419_v59 = vmul.f32 %v413_v54, %v413_v54  ;;  %v415_v60 = vadd.f32 %v570_v57, %v501_v41  ;;  %v394_v61 = vpop.f32.mrb[5].mxu1 }
 0x1b9   :  { %v428_v62 = vmul.f32 0.044715, %v422_v55  ;;  %v418_v63 = vmul.f32 %v412_v56, %v412_v56  ;;  %v414_v0 = vadd.f32 %v501_v41, %v394_v61 }
 0x1ba   :  { %v435_v1 = vadd.f32 %v429_v58, %v411_v45  ;;  %v425_v2 = vmul.f32 %v419_v59, %v413_v54  ;;  %v421_v3 = vmul.f32 %v415_v60, %v415_v60 }
 0x1bb   :  { %v434_v4 = vadd.f32 %v428_v62, %v410_v46  ;;  %v424_v5 = vmul.f32 %v418_v63, %v412_v56  ;;  %v420_v6 = vmul.f32 %v414_v0, %v414_v0 }
 0x1bc   :  { %v441_v7 = vmul.f32 0.7978846, %v435_v1  ;;  %v431_v8 = vmul.f32 0.044715, %v425_v2  ;;  %v427_v9 = vmul.f32 %v421_v3, %v415_v60 }
 0x1bd   :  { %v440_v10 = vmul.f32 0.7978846, %v434_v4  ;;  %v430_v11 = vmul.f32 0.044715, %v424_v5  ;;  %v426_v12 = vmul.f32 %v420_v6, %v414_v0 }
 0x1be   :  { %593 = vtanh.f32 %v441_v7  ;;  %v437_v13 = vadd.f32 %v431_v8, %v413_v54  ;;  %v433_v14 = vmul.f32 0.044715, %v427_v9 }
 0x1bf   :  { %595 = vtanh.f32 %v440_v10  ;;  %v436_v15 = vadd.f32 %v430_v11, %v412_v56  ;;  %v432_v16 = vmul.f32 0.044715, %v426_v12 }
 0x1c0   :  { %v443_v17 = vmul.f32 0.7978846, %v437_v13  ;;  %v439_v18 = vadd.f32 %v433_v14, %v415_v60 }
 0x1c1   :  { %v442_v19 = vmul.f32 0.7978846, %v436_v15  ;;  %v438_v20 = vadd.f32 %v432_v16, %v414_v0 }
 0x1c2   :  { %597 = vtanh.f32 %v443_v17  ;;  %v445_v21 = vmul.f32 0.7978846, %v439_v18 }
 0x1c3   :  { %599 = vtanh.f32 %v442_v19  ;;  %v444_v22 = vmul.f32 0.7978846, %v438_v20 }
 0x1c4   :  { %601 = vtanh.f32 %v445_v21 }
 0x1c5   :  { %603 = vtanh.f32 %v444_v22 }
 0x1c8   :  { %v594_v23 = vpop.eup %593 }
 0x1c9   :  { %v596_v24 = vpop.eup %595  ;;  %v453_v25 = vadd.f32 1.0, %v594_v23 }
 0x1ca   :  { %v452_v26 = vadd.f32 1.0, %v596_v24 }
 0x1cb   :  { %v459_v27 = vmul.f32 0.5, %v453_v25 }
 0x1cc   :  { %v598_v28 = vpop.eup %597  ;;  %v458_v29 = vmul.f32 0.5, %v452_v26 }
 0x1cd   :  { %v600_v30 = vpop.eup %599  ;;  %v465_v31 = vmul.f32 %v459_v27, %v411_v45  ;;  %v455_v32 = vadd.f32 1.0, %v598_v28 }
 0x1ce   :  { %v602_v33 = vpop.eup %601  ;;  %v464_v34 = vmul.f32 %v458_v29, %v410_v46  ;;  %v454_v35 = vadd.f32 1.0, %v600_v30 }
 0x1cf   :  { %v604_v36 = vpop.eup %603  ;;  %471 = vst.msk [vmem:[%s760_s7 + $0x8] sm:$0xff] %vm289_vm4, %v465_v31  ;;  %v461_v37 = vmul.f32 0.5, %v455_v32  ;;  %v457_v38 = vadd.f32 1.0, %v602_v33 }
 0x1d0   :  { %470 = vst.msk [vmem:[%s760_s7] sm:$0xff] %vm289_vm4, %v464_v34  ;;  %v460_v39 = vmul.f32 0.5, %v454_v35  ;;  %v456_v40 = vadd.f32 1.0, %v604_v36 }
 0x1d1   :  { %v467_v41 = vmul.f32 %v461_v37, %v413_v54  ;;  %v463_v42 = vmul.f32 0.5, %v457_v38 }
 0x1d2   :  { %v466_v43 = vmul.f32 %v460_v39, %v412_v56  ;;  %v462_v44 = vmul.f32 0.5, %v456_v40 }
 0x1d3   :  { %473 = vst.msk [vmem:[%s760_s7 + $0x18] sm:$0xff] %vm289_vm4, %v467_v41  ;;  %v469_v45 = vmul.f32 %v463_v42, %v415_v60 }
 0x1d4   :  { %472 = vst.msk [vmem:[%s760_s7 + $0x10] sm:$0xff] %vm289_vm4, %v466_v43  ;;  %v468_v46 = vmul.f32 %v462_v44, %v414_v0 }
 0x1d5   :  { %475 = vst.msk [vmem:[%s760_s7 + $0x28] sm:$0xff] %vm289_vm4, %v469_v45 }
 0x1d6   :  { %474 = vst.msk [vmem:[%s760_s7 + $0x20] sm:$0xff] %vm289_vm4, %v468_v46 }

</bundles_post_ra>
